<compile_context>
chip_gen: v7x
topology: tpu7x:2x2x1
jax: 0.10.0
libtpu: 0.0.40
codegen_flags: <defaults>
</compile_context>

<pallas_src>
import functools

import jax
import jax.numpy as jnp
from jax.experimental import pallas as pl
from jax.experimental.pallas import tpu as pltpu

LANES = 128            # vreg lane width
SUBLANES = 8           # f32 vreg sublane height
TM = 8192              # default rows per grid tile: (8192,128) f32 = 4 MiB/buffer
DEFAULT_NUM_CORES = 2  # v7x has 2 TensorCores per chip


def _largest_divisor(n, candidates):
    for c in candidates:
        if n % c == 0:
            return c
    return None


def _num_tensorcores():
    """2 on v7x-class chips (2 TCs/chip), 1 on v5e/v6e.  Correctness never
    depends on this: a wrong guess only adds at most one redundant clamped
    grid step on a single-TC chip."""
    try:
        kind = jax.devices()[0].device_kind.lower()
    except Exception:
        return DEFAULT_NUM_CORES
    if "lite" in kind or "v5e" in kind or "v6e" in kind:
        return 1
    return DEFAULT_NUM_CORES


def _sublane_pack(dtype):
    # Rows of a dense (rows,128) block must be a multiple of the dtype's
    # sublane packing: 8 for 4-byte, 16 for 2-byte (bf16), 32 for 1-byte.
    itemsize = jnp.dtype(dtype).itemsize
    return max(SUBLANES, 32 // max(int(itemsize), 1))


def _charbonnier_kernel(x_ref, y_ref, out_ref, *, eps_sq, rows_total, tm,
                        num_tiles, tiles_per_core, acc_rows, chunk_rows):
    c = pl.program_id(0)            # core / output-slab index
    t = pl.program_id(1)            # row-tile index within this core's range
    gi = c * tiles_per_core + t     # global row-tile index

    @pl.when(t == 0)
    def _init():
        out_ref[...] = jnp.zeros_like(out_ref)

    n_chunks = tm // chunk_rows     # static
    unroll = min(2, n_chunks)

    def chunk_vals(i):
        start = pl.multiple_of(i * chunk_rows, chunk_rows)
        xv = x_ref[pl.ds(start, chunk_rows), :].astype(jnp.float32)
        yv = y_ref[pl.ds(start, chunk_rows), :].astype(jnp.float32)
        d = xv - yv
        return jnp.sqrt(d * d + jnp.float32(eps_sq))

    def accumulate(vals):
        # (chunk_rows,128) -> (chunk_rows//acc_rows, acc_rows, 128); reducing
        # the leading axis is pure vreg VPU adds into acc_rows//8 independent
        # (8,128) accumulator chains (no single serialized add chain).  The
        # one cross-lane reduction happens once, in the JAX glue.
        out_ref[...] += jnp.sum(vals.reshape(-1, acc_rows, LANES), axis=0)

    # Hot path: interior tiles are fully valid -> no masking, no iota.
    @pl.when(gi < num_tiles - 1)
    def _interior():
        def body(i, carry):
            accumulate(chunk_vals(i))
            return carry
        jax.lax.fori_loop(0, n_chunks, body, 0, unroll=unroll)

    # Last valid tile: mask rows past the true row count (a partial edge block
    # leaves stale VMEM data in the tail rows of the buffer).  The bound is a
    # small tile-local row count -> no 32-bit flat-index overflow possible.
    @pl.when(gi == num_tiles - 1)
    def _last():
        valid_rows = rows_total - gi * tm

        def body(i, carry):
            vals = chunk_vals(i)
            row = i * chunk_rows + jax.lax.broadcasted_iota(
                jnp.int32, vals.shape, 0)
            accumulate(jnp.where(row < valid_rows, vals, jnp.float32(0.0)))
            return carry
        jax.lax.fori_loop(0, n_chunks, body, 0, unroll=unroll)
    # gi > num_tiles - 1: padded grid steps of the multi-core split do nothing
    # (their DMA index is clamped in the index_map, their compute is skipped).


def charbonnier_loss(x, y, eps=1e-3, *, tile_rows=TM):
    """Pallas TPU implementation of CharbonnierLoss.forward(x, y)."""
    assert x.shape == y.shape
    orig_dtype = x.dtype
    n = x.size
    eps_sq = float(eps) * float(eps)

    xf = x.reshape(-1)   # free bitcast for contiguous inputs
    yf = y.reshape(-1)

    pack = max(_sublane_pack(x.dtype), _sublane_pack(y.dtype))
    grain = pack * LANES                    # elements per dense row-group
    n_main = (n // grain) * grain
    n_tail = n - n_main

    # The (< grain)-element ragged tail is summed directly in JAX; no jnp.pad
    # (which would rewrite both full tensors in HBM) and no per-element mask
    # work on the kernel's hot path.
    if n_tail:
        dxt = xf[n_main:].astype(jnp.float32) - yf[n_main:].astype(jnp.float32)
        tail_sum = jnp.sum(jnp.sqrt(dxt * dxt + jnp.float32(eps_sq)))
    else:
        tail_sum = jnp.float32(0.0)

    if n_main == 0:
        total = tail_sum
    else:
        # NOTE: for aligned sizes (typical NCHW image tensors) the prefix slice
        # and reshape are free views; only ragged sizes pay one prefix copy.
        rows = n_main // LANES              # multiple of `pack` (>= 8)
        x2 = xf[:n_main].reshape(rows, LANES)
        y2 = yf[:n_main].reshape(rows, LANES)

        tm = min(int(tile_rows), rows)
        if tm < rows:
            tm = max(pack, (tm // pack) * pack)   # keep dense sublane packing
        num_tiles = int(pl.cdiv(rows, tm))

        nc = _num_tensorcores() if num_tiles >= 2 else 1
        nc = min(nc, num_tiles)
        tiles_per_core = int(pl.cdiv(num_tiles, nc))

        chunk_rows = _largest_divisor(tm, (512, 256, 128, 64, 32, 16, 8)) or tm
        acc_rows = _largest_divisor(chunk_rows, (64, 32, 16, 8)) or chunk_rows

        kernel = functools.partial(
            _charbonnier_kernel,
            eps_sq=eps_sq, rows_total=rows, tm=tm, num_tiles=num_tiles,
            tiles_per_core=tiles_per_core, acc_rows=acc_rows,
            chunk_rows=chunk_rows)

        def in_map(c, t):
            gi = c * tiles_per_core + t
            # Clamp padded grid steps (only when num_tiles % nc != 0) so they
            # never issue an out-of-bounds DMA; their compute is skipped.
            return (jnp.minimum(gi, num_tiles - 1), 0)

        itembytes = max(jnp.dtype(x.dtype).itemsize, jnp.dtype(y.dtype).itemsize)
        in_vmem = 2 * 2 * tm * LANES * int(itembytes)   # 2 inputs, double-buffered
        vmem_limit = int(min(48 * 1024 * 1024, in_vmem + 16 * 1024 * 1024))

        partial_sums = pl.pallas_call(
            kernel,
            out_shape=jax.ShapeDtypeStruct((nc * acc_rows, LANES), jnp.float32),
            grid_spec=pltpu.PrefetchScalarGridSpec(
                num_scalar_prefetch=0,
                grid=(nc, tiles_per_core),
                in_specs=[
                    pl.BlockSpec((tm, LANES), in_map),
                    pl.BlockSpec((tm, LANES), in_map),
                ],
                out_specs=pl.BlockSpec((acc_rows, LANES), lambda c, t: (c, 0)),
            ),
            compiler_params=pltpu.CompilerParams(
                dimension_semantics=("parallel", "arbitrary"),
                vmem_limit_bytes=vmem_limit,
            ),
        )(x2, y2)

        total = jnp.sum(partial_sums, dtype=jnp.float32) + tail_sum

    loss = total / jnp.float32(n)
    return loss.astype(orig_dtype)


if __name__ == "__main__":
    key = jax.random.PRNGKey(0)
    kx, ky = jax.random.split(key)

    # Small NCHW inputs consistent with an image-loss module.
    x = jax.random.normal(kx, (2, 4, 16, 16), dtype=jnp.float32)
    y = jax.random.normal(ky, (2, 4, 16, 16), dtype=jnp.float32)

    loss = jax.block_until_ready(charbonnier_loss(x, y, eps=1e-3))
    ref = jnp.mean(jnp.sqrt((x - y) ** 2 + jnp.float32(1e-3) ** 2))
    assert jnp.allclose(loss, ref, rtol=1e-5, atol=1e-6), (loss, ref)

    # Robustness: ragged element count (JAX tail path), forced multi-tile /
    # multi-core grid with a partial edge tile and a padded grid step.
    x2 = jax.random.normal(kx, (3, 3, 37, 41), dtype=jnp.float32)
    y2 = jax.random.normal(ky, (3, 3, 37, 41), dtype=jnp.float32)
    loss2 = jax.block_until_ready(charbonnier_loss(x2, y2, eps=1e-3, tile_rows=48))
    ref2 = jnp.mean(jnp.sqrt((x2 - y2) ** 2 + jnp.float32(1e-3) ** 2))
    assert jnp.allclose(loss2, ref2, rtol=1e-5, atol=1e-6), (loss2, ref2)

    print("KERNEL_OK")
</pallas_src>

<mosaic_0001>
module attributes {stable_mosaic.version = 11 : i64} {
  func.func @_charbonnier_kernel(%arg0: i32, %arg1: i32, %arg2: memref<16x128xf32, #tpu.memory_space<vmem>>, %arg3: memref<16x128xf32, #tpu.memory_space<vmem>>, %arg4: memref<16x128xf32, #tpu.memory_space<vmem>>) attributes {dimension_semantics = [#tpu.dimension_semantics<parallel>, #tpu.dimension_semantics<arbitrary>], iteration_bounds = array<i64: 1, 1>, scalar_prefetch = 0 : i64, scratch_operands = 0 : i64, tpu.core_type = #tpu.core_type<tc>, window_params = [{transform_indices = @transform_0, window_bounds = array<i64: 16, 128>}, {transform_indices = @transform_1, window_bounds = array<i64: 16, 128>}, {transform_indices = @transform_2, window_bounds = array<i64: 16, 128>}]} {
    %c1_i32 = arith.constant 1 : i32
    %0 = arith.muli %arg0, %c1_i32 : i32
    %1 = arith.addi %0, %arg1 : i32
    %c0_i32 = arith.constant 0 : i32
    %2 = arith.cmpi eq, %arg1, %c0_i32 : i32
    %3 = arith.extui %2 : i1 to i32
    %c0_i32_0 = arith.constant 0 : i32
    %4 = arith.cmpi ne, %3, %c0_i32_0 : i32
    scf.if %4 {
      %cst = arith.constant 0.000000e+00 : f32
      %11 = vector.broadcast %cst : f32 to vector<16x128xf32>
      %c0 = arith.constant 0 : index
      %c0_5 = arith.constant 0 : index
      %12 = vector.load %arg4[%c0, %c0_5] : memref<16x128xf32, #tpu.memory_space<vmem>>, vector<16x128xf32>
      tpu.vector_store %arg4[%c0, %c0_5], %11 {strides = array<i32>} : memref<16x128xf32, #tpu.memory_space<vmem>>, vector<16x128xf32>,
    } else {
    }
    %c0_i32_1 = arith.constant 0 : i32
    %5 = arith.cmpi slt, %1, %c0_i32_1 : i32
    %6 = arith.extui %5 : i1 to i32
    %c0_i32_2 = arith.constant 0 : i32
    %7 = arith.cmpi ne, %6, %c0_i32_2 : i32
    scf.if %7 {
      %c0_i32_5 = arith.constant 0 : i32
      %c16_i32 = arith.constant 16 : i32
      %11 = arith.muli %c0_i32_5, %c16_i32 : i32
      %12 = tpu.assume_multiple %11, 16 : i32
      %13 = arith.index_cast %12 : i32 to index
      %c0 = arith.constant 0 : index
      %14 = vector.load %arg2[%13, %c0] : memref<16x128xf32, #tpu.memory_space<vmem>>, vector<16x128xf32>
      %15 = arith.index_cast %12 : i32 to index
      %c0_6 = arith.constant 0 : index
      %16 = vector.load %arg3[%15, %c0_6] : memref<16x128xf32, #tpu.memory_space<vmem>>, vector<16x128xf32>
      %17 = arith.subf %14, %16 : vector<16x128xf32>
      %18 = arith.mulf %17, %17 : vector<16x128xf32>
      %cst = arith.constant 9.99999997E-7 : f32
      %19 = vector.broadcast %cst : f32 to vector<16x128xf32>
      %20 = arith.addf %18, %19 : vector<16x128xf32>
      %21 = math.sqrt %20 : vector<16x128xf32>
      %c0_7 = arith.constant 0 : index
      %c0_8 = arith.constant 0 : index
      %22 = vector.load %arg4[%c0_7, %c0_8] : memref<16x128xf32, #tpu.memory_space<vmem>>, vector<16x128xf32>
      %23 = vector.shape_cast %21 : vector<16x128xf32> to vector<1x16x128xf32>
      %cst_9 = arith.constant dense<0.000000e+00> : vector<16x128xf32>
      %24 = vector.multi_reduction <add>, %23, %cst_9 [0] : vector<1x16x128xf32> to vector<16x128xf32>
      %25 = arith.addf %22, %24 : vector<16x128xf32>
      %c0_10 = arith.constant 0 : index
      %c0_11 = arith.constant 0 : index
      %26 = vector.load %arg4[%c0_10, %c0_11] : memref<16x128xf32, #tpu.memory_space<vmem>>, vector<16x128xf32>
      tpu.vector_store %arg4[%c0_10, %c0_11], %25 {strides = array<i32>} : memref<16x128xf32, #tpu.memory_space<vmem>>, vector<16x128xf32>,
      %c1_i32_12 = arith.constant 1 : i32
    } else {
    }
    %c0_i32_3 = arith.constant 0 : i32
    %8 = arith.cmpi eq, %1, %c0_i32_3 : i32
    %9 = arith.extui %8 : i1 to i32
    %c0_i32_4 = arith.constant 0 : i32
    %10 = arith.cmpi ne, %9, %c0_i32_4 : i32
    scf.if %10 {
      %c16_i32 = arith.constant 16 : i32
      %11 = arith.muli %1, %c16_i32 : i32
      %c16_i32_5 = arith.constant 16 : i32
      %12 = arith.subi %c16_i32_5, %11 : i32
      %c0_i32_6 = arith.constant 0 : i32
      %c16_i32_7 = arith.constant 16 : i32
      %13 = arith.muli %c0_i32_6, %c16_i32_7 : i32
      %14 = tpu.assume_multiple %13, 16 : i32
      %15 = arith.index_cast %14 : i32 to index
      %c0 = arith.constant 0 : index
      %16 = vector.load %arg2[%15, %c0] : memref<16x128xf32, #tpu.memory_space<vmem>>, vector<16x128xf32>
      %17 = arith.index_cast %14 : i32 to index
      %c0_8 = arith.constant 0 : index
      %18 = vector.load %arg3[%17, %c0_8] : memref<16x128xf32, #tpu.memory_space<vmem>>, vector<16x128xf32>
      %19 = arith.subf %16, %18 : vector<16x128xf32>
      %20 = arith.mulf %19, %19 : vector<16x128xf32>
      %cst = arith.constant 9.99999997E-7 : f32
      %21 = vector.broadcast %cst : f32 to vector<16x128xf32>
      %22 = arith.addf %20, %21 : vector<16x128xf32>
      %23 = math.sqrt %22 : vector<16x128xf32>
      %c16_i32_9 = arith.constant 16 : i32
      %24 = arith.muli %c0_i32_6, %c16_i32_9 : i32
      %25 = tpu.iota {dimensions = array<i32: 0>} : vector<16x128xi32>
      %26 = vector.broadcast %24 : i32 to vector<16x128xi32>
      %27 = arith.addi %26, %25 : vector<16x128xi32>
      %28 = vector.broadcast %12 : i32 to vector<16x128xi32>
      %29 = arith.cmpi slt, %27, %28 : vector<16x128xi32>
      %cst_10 = arith.constant 0.000000e+00 : f32
      %30 = vector.broadcast %cst_10 : f32 to vector<16x128xf32>
      %31 = arith.select %29, %23, %30 : vector<16x128xi1>, vector<16x128xf32>
      %c0_11 = arith.constant 0 : index
      %c0_12 = arith.constant 0 : index
      %32 = vector.load %arg4[%c0_11, %c0_12] : memref<16x128xf32, #tpu.memory_space<vmem>>, vector<16x128xf32>
      %33 = vector.shape_cast %31 : vector<16x128xf32> to vector<1x16x128xf32>
      %cst_13 = arith.constant dense<0.000000e+00> : vector<16x128xf32>
      %34 = vector.multi_reduction <add>, %33, %cst_13 [0] : vector<1x16x128xf32> to vector<16x128xf32>
      %35 = arith.addf %32, %34 : vector<16x128xf32>
      %c0_14 = arith.constant 0 : index
      %c0_15 = arith.constant 0 : index
      %36 = vector.load %arg4[%c0_14, %c0_15] : memref<16x128xf32, #tpu.memory_space<vmem>>, vector<16x128xf32>
      tpu.vector_store %arg4[%c0_14, %c0_15], %35 {strides = array<i32>} : memref<16x128xf32, #tpu.memory_space<vmem>>, vector<16x128xf32>,
      %c1_i32_16 = arith.constant 1 : i32
    } else {
    }
    return
  }
  func.func @transform_0(%arg0: i32, %arg1: i32) -> (i32, i32) {
    %c1_i32 = arith.constant 1 : i32
    %0 = arith.muli %arg0, %c1_i32 : i32
    %1 = arith.addi %0, %arg1 : i32
    %c0_i32 = arith.constant 0 : i32
    %2 = arith.minsi %1, %c0_i32 : i32
    %c0_i32_0 = arith.constant 0 : i32
    %c0_i32_1 = arith.constant 0 : i32
    return %2, %c0_i32_0 : i32, i32
  }
  func.func @transform_1(%arg0: i32, %arg1: i32) -> (i32, i32) {
    %c1_i32 = arith.constant 1 : i32
    %0 = arith.muli %arg0, %c1_i32 : i32
    %1 = arith.addi %0, %arg1 : i32
    %c0_i32 = arith.constant 0 : i32
    %2 = arith.minsi %1, %c0_i32 : i32
    %c0_i32_0 = arith.constant 0 : i32
    %c0_i32_1 = arith.constant 0 : i32
    return %2, %c0_i32_0 : i32, i32
  }
  func.func @transform_2(%arg0: i32, %arg1: i32) -> (i32, i32) {
    %c0_i32 = arith.constant 0 : i32
    %c0_i32_0 = arith.constant 0 : i32
    return %arg0, %c0_i32 : i32, i32
  }
}

</mosaic_0001>

<bundles_post_ra>
// kernel: tpu_custom_call.1
= control target key start
LH: loop header
LB: loop body
LE: loop exit
PB: predicated region body
PF: predicated region fallthrough
CT: control target
= control target key end

     0   :  { %7 = vsyncpa [#allocation3], 0  ;;  %s318_s0 = inlined_call_operand.hbm [shape: f32[16,128], index: 0, kind: input, shape index: {}]   ;;  %s319_s1 = inlined_call_operand.hbm [shape: f32[16,128], index: 1, kind: input, shape index: {}]   ;;  %s320_s2 = inlined_call_operand.hbm [shape: f32[16,128], index: 2, kind: output, shape index: {}]  }
   0x1   :  { %8 = vsyncpa [#allocation6], 0 }
   0x2   :  { %9 = vsyncpa [#allocation4], 0  ;;  %s253_s9 = smov [#allocation2]   ;;  %s181_s13 = scalar_lea.hbm %s318_s0, 256 }
   0x3   :  { %s21_s10 = sshll.u32 %s253_s9, 4  ;;  %p182_p0 = scmp.ne.s32.totalorder %s318_s0, %s181_s13  ;;  %s22_s10 = int_to_ptr.vmem [resolvable:$true] %s21_s10 }
   0x4   :  { %p185_p1 = scmp.lt.u32.totalorder %s181_s13, %s318_s0 }
   0x6   :  { %p187_p2 = pnand %p185_p1, %p182_p0 }
   0x8   :  { %190 = shalt.err (!%p187_p2)
}
   0x9   :  { %s191_s18 = scalar_lea.vmem %s22_s10, 256  ;;  %p196_p4 = scmp.lt.s32.totalorder %s22_s10, %s22_s10 }
   0xa   :  { %p192_p3 = scmp.ne.s32.totalorder %s22_s10, %s191_s18  ;;  %p197_p5 = scmp.lt.s32.totalorder %s191_s18, %s191_s18 }
   0xc   :  { %p198_p6 = por %p197_p5, %p196_p4 }
   0xe   :  { %p199_p7 = pnand %p198_p6, %p192_p3 }
  0x10   :  { %202 = shalt.err (!%p199_p7)
}
  0x11   :  { %s254_s19 = smov 128   ;;  %s255_s20 = smov 8  }
  0x12   :  { %27 = dma.hbm_to_vmem [thread:$0]  %s318_s0, 256, %s22_s10, [#allocation3], %s254_s19, %s254_s19, %s255_s20  }
  0x13   :  { %s256_s23 = smov [#allocation5]   ;;  %s203_s27 = scalar_lea.hbm %s319_s1, 256 }
  0x14   :  { %s39_s24 = sshll.u32 %s256_s23, 4  ;;  %p204_p8 = scmp.ne.s32.totalorder %s319_s1, %s203_s27  ;;  %s40_s24 = int_to_ptr.vmem [resolvable:$true] %s39_s24 }
  0x15   :  { %p207_p9 = scmp.lt.u32.totalorder %s203_s27, %s319_s1 }
  0x17   :  { %p209_p10 = pnand %p207_p9, %p204_p8 }
  0x19   :  { %212 = shalt.err (!%p209_p10)
}
  0x1a   :  { %s213_s4 = scalar_lea.vmem %s40_s24, 256  ;;  %p218_p12 = scmp.lt.s32.totalorder %s40_s24, %s40_s24 }
  0x1b   :  { %p214_p11 = scmp.ne.s32.totalorder %s40_s24, %s213_s4  ;;  %p219_p13 = scmp.lt.s32.totalorder %s213_s4, %s213_s4 }
  0x1d   :  { %p220_p0 = por %p219_p13, %p218_p12 }
  0x1f   :  { %p221_p1 = pnand %p220_p0, %p214_p11 }
  0x21   :  { %224 = shalt.err (!%p221_p1)
}
  0x22   :  { %45 = dma.hbm_to_vmem [thread:$0]  %s319_s1, 256, %s40_s24, [#allocation6], %s254_s19, %s254_s19, %s255_s20  }
  0x23   :  { %247 = dma.done.wait [#allocation3], 256  }
  0x24   :  { %248 = vsyncadd [#allocation3], 4294967040 }
  0x25   :  { %249 = dma.done.wait [#allocation6], 256  }
  0x26   :  { %250 = vsyncadd [#allocation6], 4294967040  ;;  %v109_v0 = vld [vmem:[#allocation2] sm:$0xff]  ;;  %v111_v1 = vld [vmem:[#allocation5] sm:$0xff]  ;;  %s257_s1 = smov [#allocation7]  }
  0x27   :  { %v110_v2 = vld [vmem:[#allocation2 + $0x8] sm:$0xff]  ;;  %v113_v3 = vsub.f32 %v109_v0, %v111_v1  ;;  %v112_v4 = vld [vmem:[#allocation5 + $0x8] sm:$0xff]  ;;  %s154_s6 = sshll.u32 %s257_s1, 4  ;;  %s155_s6 = int_to_ptr.vmem [resolvable:$true] %s154_s6 }
  0x28   :  { %v114_v5 = vsub.f32 %v110_v2, %v112_v4  ;;  %s225_s7 = scalar_lea.vmem %s155_s6, 256  ;;  %p230_p3 = scmp.lt.s32.totalorder %s155_s6, %s155_s6 }
  0x29   :  { %v115_v6 = vmul.f32 %v113_v3, %v113_v3  ;;  %p226_p2 = scmp.ne.s32.totalorder %s155_s6, %s225_s7  ;;  %p231_p4 = scmp.lt.s32.totalorder %s225_s7, %s225_s7 }
  0x2a   :  { %v116_v7 = vmul.f32 %v114_v5, %v114_v5 }
  0x2b   :  { %v117_v8 = vadd.f32 1e-06, %v115_v6  ;;  %p232_p5 = por %p231_p4, %p230_p3 }
  0x2c   :  { %v118_v9 = vadd.f32 1e-06, %v116_v7 }
  0x2d   :  { %177 = vrsqrt.f32 %v117_v8  ;;  %vm121_vm0 = vcmp.eq.f32.partialorder %v117_v8, inf  ;;  %v124_v11 = vand.u32 2147483648, %v117_v8  ;;  %vm123_vm1 = vcmp.eq.f32.partialorder %v117_v8, 0.0  ;;  %p233_p6 = pnand %p232_p5, %p226_p2 }
  0x2e   :  { %179 = vrsqrt.f32 %v118_v9  ;;  %vm128_vm2 = vcmp.eq.f32.partialorder %v118_v9, inf  ;;  %v131_v14 = vand.u32 2147483648, %v118_v9  ;;  %vm130_vm3 = vcmp.eq.f32.partialorder %v118_v9, 0.0 }
  0x37   :  { %v178_v10 = vpop.eup %177 }
  0x38   :  { %v180_v12 = vpop.eup %179  ;;  %v120_v13 = vmul.f32 %v178_v10, %v117_v8 }
  0x39   :  { %v127_v15 = vmul.f32 %v180_v12, %v118_v9 }
  0x3a   :  { %v122_v16 = vsel %vm121_vm0, %v117_v8, %v120_v13 }
  0x3b   :  { %v125_v17 = vsel %vm123_vm1, %v124_v11, %v122_v16  ;;  %v129_v18 = vsel %vm128_vm2, %v118_v9, %v127_v15 }
  0x3c   :  { %v132_v19 = vsel %vm130_vm3, %v131_v14, %v129_v18  ;;  %147 = vst [vmem:[#allocation7] sm:$0xff] %v125_v17 }
  0x3d   :  { %148 = vst [vmem:[#allocation7 + $0x8] sm:$0xff] %v132_v19 }
  0x3e   :  { %236 = shalt.err (!%p233_p6)
}
  0x3f   :  { %s237_s10 = scalar_lea.hbm %s320_s2, 256 }
  0x40   :  { %p238_p7 = scmp.ne.s32.totalorder %s320_s2, %s237_s10  ;;  %p241_p8 = scmp.lt.u32.totalorder %s237_s10, %s320_s2 }
  0x42   :  { %p243_p9 = pnand %p241_p8, %p238_p7 }
  0x44   :  { %246 = shalt.err (!%p243_p9)
}
  0x45   :  { %160 = dma.vmem_to_hbm [thread:$0]  %s155_s6, 256, %s320_s2, [#allocation4], %s254_s19, %s254_s19, %s255_s20  }
  0x46   :  { %251 = dma.done.wait [#allocation4], 256  }
  0x47   :  { %252 = vsyncadd [#allocation4], 4294967040 }
  0x48   :  { %164 = vsyncpa [#allocation3], 1 }
  0x49   :  { %165 = vsyncpa [#allocation6], 1 }
  0x4a   :  { %166 = vsyncpa [#allocation4], 1 }

</bundles_post_ra>
